<compile_context>
chip_gen: v6e
topology: v6e:2x2x1
jax: 0.10.0
libtpu: 0.0.40
codegen_flags: <defaults>
</compile_context>

<pallas_src>
import functools
import math

import jax
import jax.numpy as jnp
from jax import lax
from jax.experimental import pallas as pl
from jax.experimental.pallas import tpu as pltpu


# ---------------------------------------------------------------------------
# Hardware-aware sizing helpers
# ---------------------------------------------------------------------------
def _vmem_capacity_bytes():
    """Physical VMEM per TensorCore (64 MiB on v7x, 128 MiB on v5e/v6e)."""
    try:
        info = pltpu.get_tpu_info()
        cap = int(getattr(info, "vmem_capacity_bytes"))
        if cap > 0:
            return cap
    except Exception:
        pass
    # Conservative fallback: v7x has the smallest per-TC VMEM (64 MiB).
    return 64 * 1024 * 1024


def _device_kind():
    try:
        return jax.devices()[0].device_kind.lower()
    except Exception:
        return ""


def _has_bf16_eup():
    """bf16 transcendentals (EUP) exist on v6e/v7x, not on v2-v5."""
    kind = _device_kind()
    if not kind:
        return False
    for old in ("v2", "v3", "v4", "v5"):
        if old in kind:
            return False
    return True


_VMEM_CAP = _vmem_capacity_bytes()
# Scoped limit handed to Mosaic: leave headroom for compiler-internal scratch.
VMEM_LIMIT_BYTES = int(_VMEM_CAP * 3 // 4)
# Target working-set budget for our own block sizing (stricter than the limit).
VMEM_BUDGET_BYTES = int(_VMEM_CAP * 5 // 8)


def _round_up(x, m):
    return ((x + m - 1) // m) * m


def _pick_tile(n, preferred):
    """Largest multiple of 8 dividing n and <= preferred, else n (full)."""
    if n <= preferred:
        return n
    t = min(preferred, n)
    t -= t % 8
    while t >= 8:
        if n % t == 0:
            return t
        t -= 8
    return n


def _fit_tile(n, preferred, bytes_for_tile, budget):
    """Shrink the row tile until the estimated VMEM working set fits the budget."""
    t = _pick_tile(n, preferred)
    while t > 8 and bytes_for_tile(t) > budget:
        nt = _pick_tile(n, t // 2)
        if nt >= t:
            break
        t = nt
    return t


# ---------------------------------------------------------------------------
# Kernel 1: QKV projection with a single wide resident weight
# ---------------------------------------------------------------------------
def _qkv_kernel(x_ref, w_ref, q_ref, kv_ref, *, inner_dim):
    # x_ref: (1, TN, inp)  w_ref: (inp, 3*H*D)  q_ref: (1, TN, H*D)  kv_ref: (1, TN, 2*H*D)
    res = jnp.dot(x_ref[0], w_ref[...], preferred_element_type=jnp.float32)  # (TN, 3*H*D)
    q_ref[0] = res[:, :inner_dim].astype(q_ref.dtype)       # lane slices at 128-multiples
    kv_ref[0] = res[:, inner_dim:].astype(kv_ref.dtype)


def qkv_projection(x, w_qkv_t, inner_dim, *, row_tile=512):
    B, N, inp = x.shape
    three_hd = w_qkv_t.shape[1]
    item = x.dtype.itemsize

    def tile_bytes(tn):
        streamed = 2 * (tn * inp * item + tn * three_hd * item)   # double-buffered in/out
        resident = inp * three_hd * item                          # weight, DMA'd once
        scratch = tn * three_hd * 4                               # f32 matmul result
        return streamed + resident + scratch

    tn = _fit_tile(N, row_tile, tile_bytes, VMEM_BUDGET_BYTES)
    grid = (B, N // tn)
    flops = 2 * B * N * inp * three_hd
    bytes_accessed = int(x.size * item + w_qkv_t.size * w_qkv_t.dtype.itemsize
                         + B * N * three_hd * item)
    q_sds = jax.ShapeDtypeStruct((B, N, inner_dim), x.dtype)
    kv_sds = jax.ShapeDtypeStruct((B, N, 2 * inner_dim), x.dtype)
    return pl.pallas_call(
        functools.partial(_qkv_kernel, inner_dim=inner_dim),
        grid=grid,
        in_specs=[
            pl.BlockSpec((1, tn, inp), lambda b, i: (b, i, 0)),
            pl.BlockSpec((inp, three_hd), lambda b, i: (0, 0)),   # resident for whole call
        ],
        out_specs=[
            pl.BlockSpec((1, tn, inner_dim), lambda b, i: (b, i, 0)),
            pl.BlockSpec((1, tn, 2 * inner_dim), lambda b, i: (b, i, 0)),
        ],
        out_shape=(q_sds, kv_sds),
        compiler_params=pltpu.CompilerParams(
            dimension_semantics=("parallel", "parallel"),
            vmem_limit_bytes=VMEM_LIMIT_BYTES),
        cost_estimate=pl.CostEstimate(flops=int(flops), transcendentals=0,
                                      bytes_accessed=bytes_accessed),
    )(x, w_qkv_t)


# ---------------------------------------------------------------------------
# Kernel 2: fused attention (scale-in-q, bias, softmax, PV) + output projection
# ---------------------------------------------------------------------------
def _attention_body(q_ref, kv_ref, bias_ref, *, heads, dim_head, scale, exp_dtype,
                    approx_recip):
    HD = heads * dim_head
    # Fold 1/sqrt(D) into the small q tile (tq*H*D multiplies, not tq*N per head).
    q = q_ref[0] * jnp.array(scale, dtype=q_ref.dtype)       # (TQ, H*D)
    kv = kv_ref[0]                                           # (N, 2*H*D), resident across q-tiles
    outs = []
    for h in range(heads):                                   # heads looped over resident K/V
        qh = q[:, h * dim_head:(h + 1) * dim_head]
        kh = kv[:, h * dim_head:(h + 1) * dim_head]
        vh = kv[:, HD + h * dim_head:HD + (h + 1) * dim_head]
        # Q @ K^T without materializing K^T (contract on D).
        dots = lax.dot_general(qh, kh, (((1,), (1,)), ((), ())),
                               preferred_element_type=jnp.float32)        # (TQ, N) f32
        dots = dots + bias_ref[h].astype(jnp.float32)
        m = jnp.max(dots, axis=-1, keepdims=True)
        p = jnp.exp((dots - m).astype(exp_dtype))            # bf16 exp only on v6e/v7x bf16 path
        l = jnp.sum(p.astype(jnp.float32), axis=-1, keepdims=True)
        pv = jnp.dot(p.astype(kv.dtype), vh, preferred_element_type=jnp.float32)
        # Normalize AFTER the PV matmul: tq*D multiplies + reciprocal, not tq*N divides.
        outs.append(pv * pl.reciprocal(l, approx=approx_recip))
    # Head merge 'b h n d -> b n (h d)' stays in registers, lane-dense (TQ, H*D).
    return jnp.concatenate(outs, axis=-1)


def _attn_proj_kernel(q_ref, kv_ref, bias_ref, wout_ref, bout_ref, o_ref, **kw):
    attn = _attention_body(q_ref, kv_ref, bias_ref, **kw)
    # Single K = H*D matmul for the output Linear (weights resident, lane-padded output).
    out = jnp.dot(attn.astype(wout_ref.dtype), wout_ref[...],
                  preferred_element_type=jnp.float32)
    o_ref[0] = (out + bout_ref[...]).astype(o_ref.dtype)


def _attn_noproj_kernel(q_ref, kv_ref, bias_ref, o_ref, **kw):
    o_ref[0] = _attention_body(q_ref, kv_ref, bias_ref, **kw).astype(o_ref.dtype)


def fused_attention(q, kv, rel_bias, w_out, b_out, *, heads, dim_head, scale,
                    exp_dtype, approx_recip, q_tile=512):
    B, N, HD = q.shape
    item = q.dtype.itemsize
    bias_item = rel_bias.dtype.itemsize
    project_out = w_out is not None
    out_w = w_out.shape[-1] if project_out else HD

    def tile_bytes(tq):
        streamed = 2 * (tq * HD * item + heads * tq * N * bias_item + tq * out_w * 4)
        resident = 2 * (N * 2 * HD * item)                     # K/V block (double-buffered)
        if project_out:
            resident += HD * out_w * item + out_w * 4
        scratch = 3 * tq * N * 4                               # score / exp / sum intermediates
        return streamed + resident + scratch

    tq = _fit_tile(N, q_tile, tile_bytes, VMEM_BUDGET_BYTES)
    n_qt = N // tq
    # q-tiles outer (parallel for megacore), batch inner so the bias block — the
    # largest streamed operand — is resident across the batch axis.
    grid = (n_qt, B)
    sem = ("parallel", "parallel") if n_qt < 2 else ("parallel", "arbitrary")

    kw = dict(heads=heads, dim_head=dim_head, scale=scale,
              exp_dtype=exp_dtype, approx_recip=approx_recip)

    flops = 4 * B * heads * N * N * dim_head
    if project_out:
        flops += 2 * B * N * HD * out_w
    bytes_accessed = int(B * N * HD * item                     # q
                         + B * n_qt * N * 2 * HD * item        # kv (re-streamed per q-tile)
                         + heads * N * N * bias_item           # bias (resident across batch)
                         + B * N * out_w * 4)                  # output
    if project_out:
        bytes_accessed += int(HD * out_w * item + out_w * 4)

    in_specs = [
        pl.BlockSpec((1, tq, HD), lambda i, b: (b, i, 0)),
        pl.BlockSpec((1, N, 2 * HD), lambda i, b: (b, 0, 0)),      # full K/V per batch element
        pl.BlockSpec((heads, tq, N), lambda i, b: (0, i, 0)),      # bias: constant across b
    ]
    args = [q, kv, rel_bias]
    if project_out:
        in_specs += [
            pl.BlockSpec((HD, out_w), lambda i, b: (0, 0)),        # resident output weight
            pl.BlockSpec((1, out_w), lambda i, b: (0, 0)),         # resident output bias
        ]
        args += [w_out, b_out]
        kernel = functools.partial(_attn_proj_kernel, **kw)
    else:
        kernel = functools.partial(_attn_noproj_kernel, **kw)

    return pl.pallas_call(
        kernel,
        grid=grid,
        in_specs=in_specs,
        out_specs=pl.BlockSpec((1, tq, out_w), lambda i, b: (b, i, 0)),
        out_shape=jax.ShapeDtypeStruct((B, N, out_w), jnp.float32),
        compiler_params=pltpu.CompilerParams(
            dimension_semantics=sem,
            vmem_limit_bytes=VMEM_LIMIT_BYTES),
        cost_estimate=pl.CostEstimate(flops=int(flops),
                                      transcendentals=int(B * heads * N * N),
                                      bytes_accessed=int(bytes_accessed)),
    )(*args)


# ---------------------------------------------------------------------------
# Module wrapper (mirrors the PyTorch Attention forward)
# ---------------------------------------------------------------------------
class AttentionPallas:
    def __init__(self, inp, oup, image_size, heads=8, dim_head=32, dropout=0.0,
                 *, key, compute_dtype=jnp.float32):
        inner_dim = dim_head * heads
        self.ih, self.iw = image_size
        self.heads = heads
        self.dim_head = dim_head
        self.inner_dim = inner_dim
        self.inp = inp
        self.oup = oup
        self.scale = dim_head ** (-0.5)
        self.project_out = not (heads == 1 and dim_head == inp)
        self.compute_dtype = jnp.dtype(compute_dtype)
        # TODO(synk): Dropout(p=0.0) is the identity; a PRNG dropout kernel is not implemented.

        k1, k2, k3, k4 = jax.random.split(key, 4)

        # to_qkv: Linear(inp, 3*inner_dim, bias=False); PyTorch weight is (3*inner, inp).
        # The kernel consumes its transpose (inp, 3*inner) so a single wide matmul
        # produces q|k|v already in the '(h d)' column ordering of the reference rearrange.
        self.w_qkv = jax.random.normal(k1, (3 * inner_dim, inp), jnp.float32) / math.sqrt(inp)
        self.w_qkv_t = jnp.asarray(self.w_qkv.T)               # (inp, 3*inner)

        # relative position bias table (PyTorch inits zeros; small random so the path is exercised)
        n_table = (2 * self.ih - 1) * (2 * self.iw - 1)
        self.relative_bias_table = 0.02 * jax.random.normal(k2, (n_table, heads), jnp.float32)

        # relative index (static buffer, identical to the PyTorch construction)
        n = self.ih * self.iw
        ch, cw = jnp.meshgrid(jnp.arange(self.ih), jnp.arange(self.iw), indexing="ij")
        coords = jnp.stack([ch.reshape(-1), cw.reshape(-1)])          # (2, n)
        rel = coords[:, :, None] - coords[:, None, :]                 # (2, n, n)
        idx = (rel[0] + self.ih - 1) * (2 * self.iw - 1) + (rel[1] + self.iw - 1)
        self.rel_index = idx.reshape(-1)                              # (n*n,)

        # (H, n, n) bias, gathered once (tiny static lookup; stays in plain JAX).
        # Stored in the compute dtype: bf16 halves the largest streamed operand's HBM traffic.
        self.rel_bias = (self.relative_bias_table[self.rel_index]
                         .reshape(n, n, heads).transpose(2, 0, 1)
                         .astype(self.compute_dtype))

        # to_out: Linear(inner_dim, oup) + Dropout(0). The head merge is produced
        # lane-dense by the attention kernel, so to_out is one K=inner_dim matmul.
        if self.project_out:
            self.w_out_full = jax.random.normal(k3, (oup, inner_dim), jnp.float32) / math.sqrt(inner_dim)
            self.b_out_full = 0.01 * jax.random.normal(k4, (oup,), jnp.float32)
            self.oup_pad = _round_up(oup, 128)                 # lane-dense stores; slice only if padded
            w = self.w_out_full.T                              # (inner, oup)
            self.w_out_pad = jnp.pad(w, ((0, 0), (0, self.oup_pad - oup)))
            self.b_out_pad = jnp.pad(self.b_out_full, (0, self.oup_pad - oup)).reshape(1, self.oup_pad)

        # bf16 exp only where the EUP supports it (v6e/v7x) and on the bf16 path.
        self._exp_dtype = (jnp.bfloat16
                           if (self.compute_dtype == jnp.bfloat16 and _has_bf16_eup())
                           else jnp.float32)
        # Approximate (EUP) reciprocal for the post-PV normalization on the bf16 path;
        # exact reciprocal kept for the strict f32 path.
        self._approx_recip = self.compute_dtype == jnp.bfloat16

    def __call__(self, x):
        B, N, inp = x.shape
        assert N == self.ih * self.iw and inp == self.inp
        cd = self.compute_dtype

        q, kv = qkv_projection(x.astype(cd), self.w_qkv_t.astype(cd), self.inner_dim)

        if self.project_out:
            out = fused_attention(q, kv, self.rel_bias,
                                  self.w_out_pad.astype(cd), self.b_out_pad,
                                  heads=self.heads, dim_head=self.dim_head,
                                  scale=self.scale, exp_dtype=self._exp_dtype,
                                  approx_recip=self._approx_recip)
            if self.oup_pad != self.oup:
                # TODO(synk): unaligned oup costs one extra XLA slice-copy of the result.
                out = out[:, :, : self.oup]
            return out

        # Identity to_out: the kernel already writes 'b n (h d)' lane-dense.
        return fused_attention(q, kv, self.rel_bias, None, None,
                               heads=self.heads, dim_head=self.dim_head,
                               scale=self.scale, exp_dtype=self._exp_dtype,
                               approx_recip=self._approx_recip)


# ---------------------------------------------------------------------------
# Pure-JAX f32 reference (matches the PyTorch forward semantics)
# ---------------------------------------------------------------------------
def reference_forward(mod, x):
    x = x.astype(jnp.float32)
    B, N, _ = x.shape
    H, D = mod.heads, mod.dim_head
    inner = H * D
    qkv = jnp.einsum("bni,oi->bno", x, mod.w_qkv)                      # (B, N, 3*inner)
    q, k, v = jnp.split(qkv, 3, axis=-1)
    to_heads = lambda t: t.reshape(B, N, H, D).transpose(0, 2, 1, 3)
    q, k, v = map(to_heads, (q, k, v))
    dots = jnp.einsum("bhnd,bhmd->bhnm", q, k) * mod.scale
    bias = (mod.relative_bias_table[mod.rel_index]
            .reshape(N, N, H).transpose(2, 0, 1))[None]
    attn = jax.nn.softmax(dots + bias, axis=-1)
    out = jnp.einsum("bhnm,bhmd->bhnd", attn, v)
    out = out.transpose(0, 2, 1, 3).reshape(B, N, inner)
    if mod.project_out:
        out = out @ mod.w_out_full.T + mod.b_out_full
    return out


# ---------------------------------------------------------------------------
if __name__ == "__main__":
    key = jax.random.PRNGKey(0)
    k_par, k_x = jax.random.split(key)

    B = 2
    ih, iw = 8, 8                   # N = 64 tokens
    inp, oup = 32, 32
    heads, dim_head = 8, 32         # inner_dim = 256
    N = ih * iw

    x = jax.random.normal(k_x, (B, N, inp), jnp.float32)

    # f32 path: strict check against the pure-JAX reference
    attn_f32 = AttentionPallas(inp, oup, (ih, iw), heads, dim_head,
                               key=k_par, compute_dtype=jnp.float32)
    out = jax.block_until_ready(attn_f32(x))
    assert out.shape == (B, N, oup), out.shape

    ref = jax.block_until_ready(reference_forward(attn_f32, x))
    err = float(jnp.max(jnp.abs(out - ref)))
    if err > 2e-3:
        raise AssertionError(f"f32 Pallas output mismatch, max abs err={err}")

    # bf16 MXU-input path (v6e/v7x throughput): loose check against the f32 reference
    attn_bf16 = AttentionPallas(inp, oup, (ih, iw), heads, dim_head,
                                key=k_par, compute_dtype=jnp.bfloat16)
    out_bf = jax.block_until_ready(attn_bf16(x))
    err_bf = float(jnp.max(jnp.abs(out_bf.astype(jnp.float32) - ref)))
    if err_bf > 0.25:
        raise AssertionError(f"bf16 Pallas output mismatch, max abs err={err_bf}")

    print("KERNEL_OK")
</pallas_src>

<mosaic_0001>
module attributes {stable_mosaic.version = 11 : i64} {
  func.func @_qkv_kernel(%arg0: i32, %arg1: i32, %arg2: memref<1x64x32xf32, #tpu.memory_space<vmem>>, %arg3: memref<32x768xf32, #tpu.memory_space<vmem>>, %arg4: memref<1x64x256xf32, #tpu.memory_space<vmem>>, %arg5: memref<1x64x512xf32, #tpu.memory_space<vmem>>) attributes {dimension_semantics = [#tpu.dimension_semantics<parallel>, #tpu.dimension_semantics<parallel>], iteration_bounds = array<i64: 2, 1>, scalar_prefetch = 0 : i64, scratch_operands = 0 : i64, tpu.core_type = #tpu.core_type<tc>, window_params = [{transform_indices = @transform_0, window_bounds = array<i64: 1, 64, 32>}, {pipeline_mode = #tpu.pipeline_mode<synchronous>, transform_indices = @transform_1, window_bounds = array<i64: 32, 768>}, {transform_indices = @transform_2, window_bounds = array<i64: 1, 64, 256>}, {transform_indices = @transform_3, window_bounds = array<i64: 1, 64, 512>}]} {
    %c0 = arith.constant 0 : index
    %c0_0 = arith.constant 0 : index
    %c0_1 = arith.constant 0 : index
    %0 = vector.load %arg2[%c0, %c0_0, %c0_1] : memref<1x64x32xf32, #tpu.memory_space<vmem>>, vector<1x64x32xf32>
    %1 = vector.shape_cast %0 : vector<1x64x32xf32> to vector<64x32xf32>
    %c0_2 = arith.constant 0 : index
    %c0_3 = arith.constant 0 : index
    %2 = vector.load %arg3[%c0_2, %c0_3] : memref<32x768xf32, #tpu.memory_space<vmem>>, vector<32x768xf32>
    %cst = arith.constant dense<0.000000e+00> : vector<64x768xf32>
    %3 = tpu.matmul %1, %2, %cst {dimension_numbers = #tpu.dot_dimension_numbers<[1], [0], [0], [1], [0, 0, 1, 1], [], []>} : vector<64x32xf32>, vector<32x768xf32>, vector<64x768xf32> -> vector<64x768xf32>
    %4 = vector.extract_strided_slice %3 {offsets = [0, 0], sizes = [64, 256], strides = [1, 1]} : vector<64x768xf32> to vector<64x256xf32>
    %c0_4 = arith.constant 0 : index
    %c0_5 = arith.constant 0 : index
    %c0_6 = arith.constant 0 : index
    %5 = vector.load %arg4[%c0_4, %c0_5, %c0_6] : memref<1x64x256xf32, #tpu.memory_space<vmem>>, vector<1x64x256xf32>
    %6 = vector.shape_cast %5 : vector<1x64x256xf32> to vector<64x256xf32>
    %7 = vector.shape_cast %4 : vector<64x256xf32> to vector<1x64x256xf32>
    tpu.vector_store %arg4[%c0_4, %c0_5, %c0_6], %7 {strides = array<i32>} : memref<1x64x256xf32, #tpu.memory_space<vmem>>, vector<1x64x256xf32>,
    %8 = vector.extract_strided_slice %3 {offsets = [0, 256], sizes = [64, 512], strides = [1, 1]} : vector<64x768xf32> to vector<64x512xf32>
    %c0_7 = arith.constant 0 : index
    %c0_8 = arith.constant 0 : index
    %c0_9 = arith.constant 0 : index
    %9 = vector.load %arg5[%c0_7, %c0_8, %c0_9] : memref<1x64x512xf32, #tpu.memory_space<vmem>>, vector<1x64x512xf32>
    %10 = vector.shape_cast %9 : vector<1x64x512xf32> to vector<64x512xf32>
    %11 = vector.shape_cast %8 : vector<64x512xf32> to vector<1x64x512xf32>
    tpu.vector_store %arg5[%c0_7, %c0_8, %c0_9], %11 {strides = array<i32>} : memref<1x64x512xf32, #tpu.memory_space<vmem>>, vector<1x64x512xf32>,
    return
  }
  func.func @transform_0(%arg0: i32, %arg1: i32) -> (i32, i32, i32) {
    %c0_i32 = arith.constant 0 : i32
    %c0_i32_0 = arith.constant 0 : i32
    return %arg0, %arg1, %c0_i32 : i32, i32, i32
  }
  func.func @transform_1(%arg0: i32, %arg1: i32) -> (i32, i32) {
    %c0_i32 = arith.constant 0 : i32
    %c0_i32_0 = arith.constant 0 : i32
    %c0_i32_1 = arith.constant 0 : i32
    return %c0_i32, %c0_i32_0 : i32, i32
  }
  func.func @transform_2(%arg0: i32, %arg1: i32) -> (i32, i32, i32) {
    %c0_i32 = arith.constant 0 : i32
    %c0_i32_0 = arith.constant 0 : i32
    return %arg0, %arg1, %c0_i32 : i32, i32, i32
  }
  func.func @transform_3(%arg0: i32, %arg1: i32) -> (i32, i32, i32) {
    %c0_i32 = arith.constant 0 : i32
    %c0_i32_0 = arith.constant 0 : i32
    return %arg0, %arg1, %c0_i32 : i32, i32, i32
  }
}

</mosaic_0001>

<bundles_post_ra>
// kernel: tpu_custom_call.1
= control target key start
LH: loop header
LB: loop body
LE: loop exit
PB: predicated region body
PF: predicated region fallthrough
CT: control target
= control target key end

     0   :  { %9 = vsyncpa [#allocation3], 0  ;;  %s1415_s0 = inlined_call_operand.vmem [shape: f32[2,64,32], index: 0, kind: input, shape index: {}]   ;;  %s1416_s1 = inlined_call_operand.vmem [shape: f32[32,768], index: 1, kind: input, shape index: {}]   ;;  %s1417_s2 = inlined_call_operand.hbm [shape: f32[2,64,256], index: 2, kind: output, shape index: {0}]   ;;  %s1418_s3 = inlined_call_operand.hbm [shape: f32[2,64,512], index: 3, kind: output, shape index: {1}]  }
   0x1   :  { %11 = vsyncpa [#allocation3 + $0x1], 0 }
   0x2   :  { %12 = vsyncpa [#allocation5], 0 }
   0x3   :  { %14 = vsyncpa [#allocation5 + $0x1], 0  ;;  %s1065_s12 = smov 0   ;;  %s1067_s13 = smov 0  }
   0x4   :  { %s1069_s14 = smov 0   ;;  %s1071_s15 = smov 0  }
   0x5   :  { %s1073_s16 = smov 0   ;;  %s1075_s17 = smov 0  }
   0x6 LB: > { %s813_s18 = sadd.s32 4294967295, %s1036_s17   ;;  %s814_s19 = sadd.s32 4294967294, %s1036_s17   ;;  %s1036_s17 = sphi %s1075_s17, %s20_s17   ;;  %s1032_s16 = sphi %s1073_s16, %s1425_s16   ;;  %s1028_s15 = sphi %s1071_s15, %s1424_s15   ;;  %s1024_s14 = sphi %s1069_s14, %s1423_s14   ;;  %s1020_s13 = sphi %s1067_s13, %s1422_s13   ;;  %s1016_s12 = sphi %s1065_s12, %s1421_s12  }
   0x7   : > { %s32_s20 = sadd.s32 1, %s1032_s16  ;;  %s90_s21 = sadd.s32 1, %s1024_s14 }
   0x8   : > { %p34_p0 = scmp.ge.s32.totalorder %s32_s20, 2  ;;  %p100_p1 = scmp.ne.s32.totalorder %s1024_s14, %s1020_s13 }
   0x9   : > { %p101_p2 = scmp.eq.s32.totalorder %s813_s18, 1  ;;  %p106_p3 = scmp.ne.s32.totalorder %s1020_s13, %s1016_s12 }
   0xa   : > { %s1427_s20 = smov (%p34_p0, %s32_s20), 0  ;;  %p107_p5 = scmp.eq.s32.totalorder %s814_s19, 1 }
   0xb   : > { %p1105_p4 = por %p101_p2, %p100_p1  ;;  %s85_s23 = ssub.s32 %s1032_s16, %s1427_s20 }
   0xc   : > { %p817_p6 = scmp.ge.s32.totalorder %s1036_s17, 1  ;;  %p88_p7 = scmp.eq.s32.totalorder %s85_s23, 0 }
   0xd   : > { %p1112_p8 = por %p107_p5, %p106_p3  ;;  %p169_p9 = scmp.lt.s32.totalorder %s1036_s17, 3 }
   0xe   : > { %s1118_s25 = scalar_select %p88_p7, %s1024_s14, %s90_s21  }
   0xf   : > { %p170_p10 = pnand %p817_p6, %p169_p9 }
  0x10   : > { %p203_p11 = scmp.lt.s32.totalorder (!%p170_p10), %s1028_s15, 1  ;;  %s1271_s28 = sand.u32 (!%p170_p10), 1, %s1020_s13  }
  0x11   : > { %173 = sbr.rel (%p170_p10) target bundleno = 295 (0x127), region = 28  ;;  %s818_s30 = sshll.u32 (!%p170_p10), %s1271_s28, 7 }
  0x12   : > { %s1274_s4 = scalar_lea.vmem (!%p170_p10), [#allocation2], %s818_s30  ;;  %s855_s5 = sshll.u32 (!%p170_p10), %s1028_s15, 11 }
  0x13   : > { %s680_s6 = sshll.u32 (!%p170_p10), %s1274_s4, 4  ;;  %s819_s7 = sshll.u32 (!%p170_p10), %s1271_s28, 8  ;;  %s1296_s6 = int_to_ptr.vmem [resolvable:$true] %s680_s6 }
  0x14   : > { %s1294_s10 = scalar_lea.hbm (!%p170_p10), %s1417_s2, %s855_s5  ;;  %s659_s11 = scalar_lea.sflag (!%p170_p10), [#allocation3], %s1271_s28 }
  0x15   : > { %s930_s18 = scalar_lea.vmem (!%p170_p10), %s1296_s6, 2048  ;;  %s1039_s19 = smov (!%p170_p10), [#allocation2]  }
  0x16   : > { %v241_v0 = vld [vmem:[%s1416_s1 + $0x98] sm:$0xff]  ;;  %v240_v1 = vld [vmem:[%s1416_s1 + $0x90] sm:$0xff]  ;;  %v235_v2 = vld [vmem:[%s1416_s1 + $0x68] sm:$0xff]  ;;  %s204_s9 = scalar_select %p203_p11, %s1028_s15, 1  ;;  %vm246_vm0 = vcmask 261120   ;;  %v1038_v12 = vmov 0.0  }
  0x17   : > { %295 = vmatprep.subr.mxu0 %v241_v0  ;;  %857 = vmatprep.subr.mxu1 %v241_v0  ;;  %v234_v3 = vld [vmem:[%s1416_s1 + $0x60] sm:$0xff]  ;;  %v229_v4 = vld [vmem:[%s1416_s1 + $0x38] sm:$0xff]  ;;  %v228_v5 = vld [vmem:[%s1416_s1 + $0x30] sm:$0xff]  ;;  %p931_p12 = scmp.ne.s32.totalorder %s1296_s6, %s930_s18 }
  0x18   : > { %296 = vmatpush1.msra.mxu0 %v240_v1  ;;  %861 = vmatpush1.msra.mxu1 %v240_v1  ;;  %v223_v6 = vld [vmem:[%s1416_s1 + $0x8] sm:$0xff]  ;;  %s854_s21 = sshll.u32 %s204_s9, 6  ;;  %v222_v7 = vld [vmem:[%s1416_s1] sm:$0xff]  ;;  %v245_v11 = vld [vmem:[%s1416_s1 + $0xb8] sm:$0xff] }
  0x19   : > { %297 = vmatprep.subr.mxu0 %v235_v2  ;;  %858 = vmatprep.subr.mxu1 %v235_v2  ;;  %s1149_s29 = scalar_lea.vmem %s1415_s0, %s854_s21  ;;  %v243_v10 = vld [vmem:[%s1416_s1 + $0xa8] sm:$0xff]  ;;  %v242_v13 = vld [vmem:[%s1416_s1 + $0xa0] sm:$0xff]  ;;  %v244_v14 = vld [vmem:[%s1416_s1 + $0xb0] sm:$0xff]  ;;  %p932_p13 = pnand %p931_p12, %p1105_p4 }
  0x1a   : > { %298 = vmatpush1.msra.mxu0 %v234_v3  ;;  %862 = vmatpush1.msra.mxu1 %v234_v3  ;;  %v1152_v8 = vld [vmem:[%s1149_s29] sm:$0xff]  ;;  %v215_v15 = vld [vmem:[%s1149_s29 + $0x8] sm:$0xff]  ;;  %v237_v17 = vld [vmem:[%s1416_s1 + $0x78] sm:$0xff]  ;;  %s934_s21 = sshll.u32 %s1039_s19, 4  ;;  %s935_s21 = int_to_ptr.vmem [resolvable:$false] %s934_s21 }
  0x1b   : > { %299 = vmatprep.subr.mxu0 %v229_v4  ;;  %859 = vmatprep.subr.mxu1 %v229_v4  ;;  %v1155_v9 = vld [vmem:[%s1149_s29 + $0x20] sm:$0xff]  ;;  %v1177_v16 = vld [vmem:[%s1149_s29 + $0x28] sm:$0xff]  ;;  %v236_v19 = vld [vmem:[%s1416_s1 + $0x70] sm:$0xff]  ;;  %p933_p0 = pneg %p932_p13  ;;  %s936_s23 = scalar_lea.vmem %s935_s21, 4096 }
  0x1c   : > { %300 = vmatpush1.msra.mxu0 %v228_v5  ;;  %863 = vmatpush1.msra.mxu1 %v228_v5  ;;  %v239_v18 = vld [vmem:[%s1416_s1 + $0x88] sm:$0xff]  ;;  %v238_v20 = vld [vmem:[%s1416_s1 + $0x80] sm:$0xff]  ;;  %v216_v21 = vld [vmem:[%s1149_s29 + $0x10] sm:$0xff]  ;;  %p937_p1 = scmp.lt.s32.totalorder %s1296_s6, %s935_s21  ;;  %p938_p2 = scmp.lt.s32.totalorder %s936_s23, %s930_s18 }
  0x1d   : > { %301 = vmatprep.subr.mxu0 %v223_v6  ;;  %860 = vmatprep.subr.mxu1 %v223_v6  ;;  %v220_v22 = vld [vmem:[%s1149_s29 + $0x30] sm:$0xff]  ;;  %v231_v23 = vld [vmem:[%s1416_s1 + $0x48] sm:$0xff]  ;;  %v233_v24 = vld [vmem:[%s1416_s1 + $0x58] sm:$0xff] }
  0x1e   : > { %302 = vmatpush1.msra.mxu0 %v222_v7  ;;  %864 = vmatpush1.msra.mxu1 %v222_v7  ;;  %v230_v25 = vld [vmem:[%s1416_s1 + $0x40] sm:$0xff]  ;;  %v232_v26 = vld [vmem:[%s1416_s1 + $0x50] sm:$0xff]  ;;  %v217_v27 = vld [vmem:[%s1149_s29 + $0x18] sm:$0xff]  ;;  %p939_p3 = por %p938_p2, %p937_p1 }
  0x1f   : > { %335 = vmatprep.mubr.f32.mxu0 %v1038_v12  ;;  %359 = vmatprep.mubr.f32.mxu1 %v1038_v12  ;;  %v221_v28 = vld [vmem:[%s1149_s29 + $0x38] sm:$0xff]  ;;  %v227_v30 = vld [vmem:[%s1416_s1 + $0x28] sm:$0xff]  ;;  %v224_v31 = vld [vmem:[%s1416_s1 + $0x10] sm:$0xff] }
  0x20   : > { %822 = vmatmul.mubr.msk.f32.vlgmr.msra.gmra.mxu0 %vm246_vm0, %v1152_v8  ;;  %826 = vmatmul.mubr.msk.f32.vlgmr.msra.gmra.mxu1 %vm246_vm0, %v1155_v9  ;;  %v225_v29 = vld [vmem:[%s1416_s1 + $0x18] sm:$0xff]  ;;  %v226_v32 = vld [vmem:[%s1416_s1 + $0x20] sm:$0xff]  ;;  %p940_p5 = pnand %p939_p3, %p933_p0 }
  0x21   : > { %408 = vmatprep.subr.mxu1 %v243_v10  ;;  %521 = vmatprep.subr.mxu0 %v245_v11 }
  0x22   : > { %409 = vmatpush1.msra.mxu1 %v242_v13  ;;  %522 = vmatpush1.msra.mxu0 %v244_v14 }
  0x23   : > { %341 = vmatprep.mubr.f32.mxu0 %v1038_v12  ;;  %365 = vmatprep.mubr.f32.mxu1 %v1038_v12 }
  0x24   : > { %823 = vmatmul.mubr.msk.f32.gmra.mxu0 %vm246_vm0, %v215_v15  ;;  %827 = vmatmul.mubr.msk.f32.gmra.mxu1 %vm246_vm0, %v1177_v16 }
  0x25   : > { %410 = vmatprep.subr.mxu1 %v237_v17  ;;  %523 = vmatprep.subr.mxu0 %v239_v18 }
  0x26   : > { %411 = vmatpush1.msra.mxu1 %v236_v19  ;;  %524 = vmatpush1.msra.mxu0 %v238_v20 }
  0x27   : > { %347 = vmatprep.mubr.f32.mxu0 %v1038_v12  ;;  %371 = vmatprep.mubr.f32.mxu1 %v1038_v12 }
  0x28   : > { %824 = vmatmul.mubr.msk.f32.gmra.mxu0 %vm246_vm0, %v216_v21  ;;  %828 = vmatmul.mubr.msk.f32.gmra.mxu1 %vm246_vm0, %v220_v22 }
  0x29   : > { %412 = vmatprep.subr.mxu1 %v231_v23  ;;  %525 = vmatprep.subr.mxu0 %v233_v24 }
  0x2a   : > { %413 = vmatpush1.msra.mxu1 %v230_v25  ;;  %526 = vmatpush1.msra.mxu0 %v232_v26 }
  0x2b   : > { %353 = vmatprep.mubr.f32.mxu0 %v1038_v12  ;;  %377 = vmatprep.mubr.f32.mxu1 %v1038_v12 }
  0x2c   : > { %825 = vmatmul.mubr.msk.f32.gmra.mxu0 %vm246_vm0, %v217_v27  ;;  %829 = vmatmul.mubr.msk.f32.gmra.mxu1 %vm246_vm0, %v221_v28 }
  0x2d   : > { %414 = vmatprep.subr.mxu1 %v225_v29  ;;  %527 = vmatprep.subr.mxu0 %v227_v30 }
  0x2e   : > { %415 = vmatpush1.msra.mxu1 %v224_v31  ;;  %528 = vmatpush1.msra.mxu0 %v226_v32 }
  0x2f   : > { %448 = vmatprep.mubr.f32.mxu1 %v1038_v12  ;;  %561 = vmatprep.mubr.f32.mxu0 %v1038_v12 }
  0x30   : > { %830 = vmatmul.mubr.msk.f32.vlgmr.msra.gmra.mxu1 %vm246_vm0, %v1152_v8  ;;  %838 = vmatmul.mubr.msk.f32.vlgmr.msra.gmra.mxu0 %vm246_vm0, %v1152_v8 }
  0x31   : > { %454 = vmatprep.mubr.f32.mxu1 %v1038_v12  ;;  %567 = vmatprep.mubr.f32.mxu0 %v1038_v12 }
  0x34   : > { %831 = vmatmul.mubr.msk.f32.gmra.mxu1 %vm246_vm0, %v215_v15  ;;  %839 = vmatmul.mubr.msk.f32.gmra.mxu0 %vm246_vm0, %v215_v15 }
  0x35   : > { %460 = vmatprep.mubr.f32.mxu1 %v1038_v12  ;;  %573 = vmatprep.mubr.f32.mxu0 %v1038_v12 }
  0x38   : > { %832 = vmatmul.mubr.msk.f32.gmra.mxu1 %vm246_vm0, %v216_v21  ;;  %840 = vmatmul.mubr.msk.f32.gmra.mxu0 %vm246_vm0, %v216_v21 }
  0x39   : > { %466 = vmatprep.mubr.f32.mxu1 %v1038_v12  ;;  %579 = vmatprep.mubr.f32.mxu0 %v1038_v12 }
  0x3c   : > { %833 = vmatmul.mubr.msk.f32.gmra.mxu1 %vm246_vm0, %v217_v27  ;;  %841 = vmatmul.mubr.msk.f32.gmra.mxu0 %vm246_vm0, %v217_v27 }
  0x3d   : > { %472 = vmatprep.mubr.f32.mxu1 %v1038_v12  ;;  %585 = vmatprep.mubr.f32.mxu0 %v1038_v12 }
  0x40   : > { %834 = vmatmul.mubr.msk.f32.gmra.mxu1 %vm246_vm0, %v1155_v9  ;;  %842 = vmatmul.mubr.msk.f32.gmra.mxu0 %vm246_vm0, %v1155_v9 }
  0x41   : > { %478 = vmatprep.mubr.f32.mxu1 %v1038_v12  ;;  %591 = vmatprep.mubr.f32.mxu0 %v1038_v12 }
  0x44   : > { %835 = vmatmul.mubr.msk.f32.gmra.mxu1 %vm246_vm0, %v1177_v16  ;;  %843 = vmatmul.mubr.msk.f32.gmra.mxu0 %vm246_vm0, %v1177_v16 }
  0x45   : > { %484 = vmatprep.mubr.f32.mxu1 %v1038_v12  ;;  %597 = vmatprep.mubr.f32.mxu0 %v1038_v12 }
  0x48   : > { %836 = vmatmul.mubr.msk.f32.gmra.mxu1 %vm246_vm0, %v220_v22  ;;  %844 = vmatmul.mubr.msk.f32.gmra.mxu0 %vm246_vm0, %v220_v22 }
  0x49   : > { %490 = vmatprep.mubr.f32.mxu1 %v1038_v12  ;;  %603 = vmatprep.mubr.f32.mxu0 %v1038_v12 }
  0x4c   : > { %837 = vmatmul.mubr.msk.f32.gmra.mxu1 %vm246_vm0, %v221_v28  ;;  %845 = vmatmul.mubr.msk.f32.gmra.mxu0 %vm246_vm0, %v221_v28 }
  0xe0   : > { %v337_v33 = vpop.f32.mrf.mxu0  ;;  %v361_v34 = vpop.f32.mrf.mxu1 }
  0xe1   : > { %610 = vst [vmem:[%s1274_s4] sm:$0xff] %v337_v33  ;;  %618 = vst [vmem:[%s1274_s4 + $0x40] sm:$0xff] %v361_v34 }
  0xe2   : > { %v339_v35 = vpop.f32.mrf.mxu0  ;;  %v363_v36 = vpop.f32.mrf.mxu1 }
  0xe3   : > { %611 = vst [vmem:[%s1274_s4 + $0x8] sm:$0xff] %v339_v35  ;;  %619 = vst [vmem:[%s1274_s4 + $0x48] sm:$0xff] %v363_v36 }
  0xe4   : > { %v343_v37 = vpop.f32.mrf.mxu0  ;;  %v367_v38 = vpop.f32.mrf.mxu1 }
  0xe5   : > { %612 = vst [vmem:[%s1274_s4 + $0x10] sm:$0xff] %v343_v37  ;;  %620 = vst [vmem:[%s1274_s4 + $0x50] sm:$0xff] %v367_v38 }
  0xe6   : > { %v345_v39 = vpop.f32.mrf.mxu0  ;;  %v369_v40 = vpop.f32.mrf.mxu1 }
  0xe7   : > { %613 = vst [vmem:[%s1274_s4 + $0x18] sm:$0xff] %v345_v39  ;;  %621 = vst [vmem:[%s1274_s4 + $0x58] sm:$0xff] %v369_v40 }
  0xe8   : > { %v349_v41 = vpop.f32.mrf.mxu0  ;;  %v373_v42 = vpop.f32.mrf.mxu1 }
  0xe9   : > { %614 = vst [vmem:[%s1274_s4 + $0x20] sm:$0xff] %v349_v41  ;;  %622 = vst [vmem:[%s1274_s4 + $0x60] sm:$0xff] %v373_v42 }
  0xea   : > { %v351_v43 = vpop.f32.mrf.mxu0  ;;  %v375_v44 = vpop.f32.mrf.mxu1 }
  0xeb   : > { %615 = vst [vmem:[%s1274_s4 + $0x28] sm:$0xff] %v351_v43  ;;  %623 = vst [vmem:[%s1274_s4 + $0x68] sm:$0xff] %v375_v44 }
  0xec   : > { %v355_v45 = vpop.f32.mrf.mxu0  ;;  %v379_v46 = vpop.f32.mrf.mxu1 }
  0xed   : > { %616 = vst [vmem:[%s1274_s4 + $0x30] sm:$0xff] %v355_v45  ;;  %624 = vst [vmem:[%s1274_s4 + $0x70] sm:$0xff] %v379_v46 }
  0xee   : > { %v357_v47 = vpop.f32.mrf.mxu0  ;;  %v381_v48 = vpop.f32.mrf.mxu1 }
  0xef   : > { %617 = vst [vmem:[%s1274_s4 + $0x38] sm:$0xff] %v357_v47  ;;  %625 = vst [vmem:[%s1274_s4 + $0x78] sm:$0xff] %v381_v48 }
  0xf0   : > { %v450_v49 = vpop.f32.mrf.mxu1  ;;  %v563_v50 = vpop.f32.mrf.mxu0 }
  0xf1   : > { %943 = shalt.err (!%p940_p5)
}
  0xf2   : > { %s944_s26 = scalar_lea.hbm %s1294_s10, 2048  ;;  %s948_s30 = scalar_lea.hbm %s1417_s2, 4096 }
  0xf3   : > { %p945_p6 = scmp.ne.s32.totalorder %s1294_s10, %s944_s26  ;;  %p949_p10 = scmp.lt.s32.totalorder %s1294_s10, %s1417_s2 }
  0xf4   : > { %p950_p11 = scmp.lt.s32.totalorder %s948_s30, %s944_s26 }
  0xf5   : > { %p946_p7 = pnand %p945_p6, %p1105_p4 }
  0xf6   : > { %p951_p12 = por %p950_p11, %p949_p10 }
  0xf7   : > { %p947_p9 = pneg %p946_p7 }
  0xf9   : > { %p952_p13 = pnand %p951_p12, %p947_p9 }
  0xfb   : > { %955 = shalt.err (!%p952_p13)
}
  0xfc   : > { %s1040_s8 = smov 256   ;;  %s1041_s9 = smov 16   ;;  %v452_v51 = vpop.f32.mrf.mxu1  ;;  %v565_v52 = vpop.f32.mrf.mxu0 }
  0xfd   : > { %865 = dma.vmem_to_hbm [thread:$0]  (%p1105_p4), %s1296_s6, 2048, %s1294_s10, %s659_s11, %s1040_s8, %s1040_s8, %s1041_s9  }
  0xfe   : > { %s1327_s18 = scalar_lea.vmem [#allocation4], %s819_s7  ;;  %v456_v53 = vpop.f32.mrf.mxu1  ;;  %v569_v54 = vpop.f32.mrf.mxu0  ;;  %s856_s6 = sshll.u32 %s1028_s15, 12 }
  0xff   : > { %626 = vst [vmem:[%s1327_s18] sm:$0xff] %v450_v49  ;;  %628 = vst [vmem:[%s1327_s18 + $0x10] sm:$0xff] %v563_v50  ;;  %s699_s7 = sshll.u32 %s1327_s18, 4  ;;  %s1362_s19 = scalar_lea.hbm %s1418_s3, %s856_s6  ;;  %s1364_s7 = int_to_ptr.vmem [resolvable:$true] %s699_s7 }
 0x100   : > { %627 = vst [vmem:[%s1327_s18 + $0x8] sm:$0xff] %v452_v51  ;;  %629 = vst [vmem:[%s1327_s18 + $0x18] sm:$0xff] %v565_v52  ;;  %v458_v55 = vpop.f32.mrf.mxu1  ;;  %v571_v56 = vpop.f32.mrf.mxu0  ;;  %s664_s15 = scalar_lea.sflag [#allocation5], %s1271_s28  ;;  %s956_s21 = scalar_lea.vmem %s1364_s7, 4096 }
 0x101   : > { %630 = vst [vmem:[%s1327_s18 + $0x20] sm:$0xff] %v456_v53  ;;  %632 = vst [vmem:[%s1327_s18 + $0x30] sm:$0xff] %v569_v54  ;;  %p957_p0 = scmp.ne.s32.totalorder %s1364_s7, %s956_s21  ;;  %s1042_s23 = smov [#allocation4]  }
 0x102   : > { %631 = vst [vmem:[%s1327_s18 + $0x28] sm:$0xff] %v458_v55  ;;  %633 = vst [vmem:[%s1327_s18 + $0x38] sm:$0xff] %v571_v56  ;;  %v462_v57 = vpop.f32.mrf.mxu1  ;;  %v575_v58 = vpop.f32.mrf.mxu0  ;;  %s960_s26 = sshll.u32 %s1042_s23, 4  ;;  %s961_s26 = int_to_ptr.vmem [resolvable:$false] %s960_s26 }
 0x103   : > { %634 = vst [vmem:[%s1327_s18 + $0x40] sm:$0xff] %v462_v57  ;;  %636 = vst [vmem:[%s1327_s18 + $0x50] sm:$0xff] %v575_v58  ;;  %p958_p1 = pnand %p957_p0, %p1105_p4  ;;  %s962_s27 = scalar_lea.vmem %s961_s26, 8192 }
 0x104   : > { %v464_v59 = vpop.f32.mrf.mxu1  ;;  %v577_v60 = vpop.f32.mrf.mxu0  ;;  %p963_p3 = scmp.lt.s32.totalorder %s1364_s7, %s961_s26  ;;  %p964_p5 = scmp.lt.s32.totalorder %s962_s27, %s956_s21 }
 0x105   : > { %635 = vst [vmem:[%s1327_s18 + $0x48] sm:$0xff] %v464_v59  ;;  %637 = vst [vmem:[%s1327_s18 + $0x58] sm:$0xff] %v577_v60  ;;  %p959_p2 = pneg %p958_p1 }
 0x106   : > { %v468_v61 = vpop.f32.mrf.mxu1  ;;  %v581_v62 = vpop.f32.mrf.mxu0  ;;  %p965_p6 = por %p964_p5, %p963_p3 }
 0x107   : > { %638 = vst [vmem:[%s1327_s18 + $0x60] sm:$0xff] %v468_v61  ;;  %640 = vst [vmem:[%s1327_s18 + $0x70] sm:$0xff] %v581_v62 }
 0x108   : > { %v470_v63 = vpop.f32.mrf.mxu1  ;;  %v583_v0 = vpop.f32.mrf.mxu0  ;;  %p966_p7 = pnand %p965_p6, %p959_p2 }
 0x109   : > { %639 = vst [vmem:[%s1327_s18 + $0x68] sm:$0xff] %v470_v63  ;;  %641 = vst [vmem:[%s1327_s18 + $0x78] sm:$0xff] %v583_v0 }
 0x10a   : > { %v474_v1 = vpop.f32.mrf.mxu1  ;;  %v587_v2 = vpop.f32.mrf.mxu0 }
 0x10b   : > { %642 = vst [vmem:[%s1327_s18 + $0x80] sm:$0xff] %v474_v1  ;;  %644 = vst [vmem:[%s1327_s18 + $0x90] sm:$0xff] %v587_v2 }
 0x10c   : > { %v476_v3 = vpop.f32.mrf.mxu1  ;;  %v589_v4 = vpop.f32.mrf.mxu0 }
 0x10d   : > { %643 = vst [vmem:[%s1327_s18 + $0x88] sm:$0xff] %v476_v3  ;;  %645 = vst [vmem:[%s1327_s18 + $0x98] sm:$0xff] %v589_v4 }
 0x10e   : > { %v480_v5 = vpop.f32.mrf.mxu1  ;;  %v593_v6 = vpop.f32.mrf.mxu0 }
 0x10f   : > { %646 = vst [vmem:[%s1327_s18 + $0xa0] sm:$0xff] %v480_v5  ;;  %648 = vst [vmem:[%s1327_s18 + $0xb0] sm:$0xff] %v593_v6 }
 0x110   : > { %v482_v7 = vpop.f32.mrf.mxu1  ;;  %v595_v8 = vpop.f32.mrf.mxu0 }
 0x111   : > { %647 = vst [vmem:[%s1327_s18 + $0xa8] sm:$0xff] %v482_v7  ;;  %649 = vst [vmem:[%s1327_s18 + $0xb8] sm:$0xff] %v595_v8 }
 0x112   : > { %v486_v9 = vpop.f32.mrf.mxu1  ;;  %v599_v10 = vpop.f32.mrf.mxu0 }
 0x113   : > { %650 = vst [vmem:[%s1327_s18 + $0xc0] sm:$0xff] %v486_v9  ;;  %652 = vst [vmem:[%s1327_s18 + $0xd0] sm:$0xff] %v599_v10 }
 0x114   : > { %v488_v11 = vpop.f32.mrf.mxu1  ;;  %v601_v12 = vpop.f32.mrf.mxu0 }
 0x115   : > { %651 = vst [vmem:[%s1327_s18 + $0xc8] sm:$0xff] %v488_v11  ;;  %653 = vst [vmem:[%s1327_s18 + $0xd8] sm:$0xff] %v601_v12 }
 0x116   : > { %v492_v13 = vpop.f32.mrf.mxu1  ;;  %v605_v14 = vpop.f32.mrf.mxu0 }
 0x117   : > { %654 = vst [vmem:[%s1327_s18 + $0xe0] sm:$0xff] %v492_v13  ;;  %656 = vst [vmem:[%s1327_s18 + $0xf0] sm:$0xff] %v605_v14 }
 0x118   : > { %v494_v15 = vpop.f32.mrf.mxu1  ;;  %v607_v16 = vpop.f32.mrf.mxu0 }
 0x119   : > { %655 = vst [vmem:[%s1327_s18 + $0xe8] sm:$0xff] %v494_v15  ;;  %657 = vst [vmem:[%s1327_s18 + $0xf8] sm:$0xff] %v607_v16 }
 0x11a   : > { %969 = shalt.err (!%p966_p7)
}
 0x11b   : > { %s970_s29 = scalar_lea.hbm %s1362_s19, 4096  ;;  %s974_s5 = scalar_lea.hbm %s1418_s3, 8192 }
 0x11c   : > { %p971_p9 = scmp.ne.s32.totalorder %s1362_s19, %s970_s29  ;;  %p975_p12 = scmp.lt.s32.totalorder %s1362_s19, %s1418_s3 }
 0x11d   : > { %p976_p13 = scmp.lt.s32.totalorder %s974_s5, %s970_s29 }
 0x11e   : > { %p972_p10 = pnand %p971_p9, %p1105_p4 }
 0x11f   : > { %p977_p0 = por %p976_p13, %p975_p12 }
 0x120   : > { %p973_p11 = pneg %p972_p10 }
 0x122   : > { %p978_p1 = pnand %p977_p0, %p973_p11 }
 0x124   : > { %981 = shalt.err (!%p978_p1)
}
 0x125   : > { %s1043_s18 = smov 512   ;;  %s1044_s6 = smov 32  }
 0x126   : > { %866 = dma.vmem_to_hbm [thread:$0]  (%p1105_p4), %s1364_s7, 4096, %s1362_s19, %s664_s15, %s1043_s18, %s1043_s18, %s1044_s6  }
 0x127 PF: > { %p876_p2 = scmp.ge.s32.totalorder %s1036_s17, 2  ;;  %s714_s10 = sand.u32 1, %s1016_s12  }
 0x128   : > { %s715_s11 = scalar_lea.sflag [#allocation3], %s714_s10 }
 0x129   : > { %p870_p3 = pnand %p876_p2, %p1112_p8 }
 0x12b   : > { %p871_p5 = pneg %p870_p3 }
 0x12d   : > { %1007 = dma.done.wait (%p871_p5), %s715_s11, 2048  }
 0x12e   : > { %1009 = vsyncadd (%p871_p5), %s715_s11, 4294965248  ;;  %s724_s21 = scalar_lea.sflag [#allocation5], %s714_s10 }
 0x12f   : > { %1011 = dma.done.wait (%p871_p5), %s724_s21, 4096  }
 0x130   : > { %1013 = vsyncadd (%p871_p5), %s724_s21, 4294963200  ;;  %s20_s17 = sadd.s32 1, %s1036_s17   ;;  %s1421_s12 = smov %s1020_s13 }
 0x131   : > { %p17_p6 = scmp.ge.s32.totalorder %s20_s17, 4   ;;  %s1422_s13 = smov %s1024_s14 }
 0x132   : > { %s1423_s14 = smov %s1118_s25  ;;  %s1424_s15 = smov %s1032_s16 }
 0x133   : > { %s1425_s16 = smov %s1427_s20  ;;  %19 = sbr.rel (!%p17_p6) target bundleno = 6 (0x6), region = 80 }
 0x138   :  { %729 = vsyncpa [#allocation3], 1 }
 0x139   :  { %731 = vsyncpa [#allocation3 + $0x1], 1 }
 0x13a   :  { %732 = vsyncpa [#allocation5], 1 }
 0x13b   :  { %734 = vsyncpa [#allocation5 + $0x1], 1 }

</bundles_post_ra>
